<compile_context>
chip_gen: v7x
topology: tpu7x:2x2x1
jax: 0.10.0
libtpu: 0.0.40
codegen_flags: <defaults>
</compile_context>

<pallas_src>
import jax
import jax.numpy as jnp
from jax.experimental import pallas as pl
from jax.experimental.pallas import tpu as pltpu

_LANES = 128
_SUBLANES = 8
_GROUP = _SUBLANES * _LANES          # elements in one (8, 128) vreg group
_WEIGHTS = (0.2, 0.2, 0.3, 0.3)


def _cdiv(a, b):
    return -(-a // b)


def _round_up(a, b):
    return _cdiv(a, b) * b


def _bce_partial_kernel(w_ref, x_ref, y_ref, out_ref):
    """One (tg, 8, 128) tile -> weighted (1, 8, 128) partial sum.

    w_ref: (grid,) f32 scalar-prefetch array in SMEM; per-tile weight w_s/n_s.
    Padding needs no mask: x pad = finfo.min, y pad = 0 -> BCE term is 0.
    """
    i = pl.program_id(0)
    x = x_ref[...].astype(jnp.float32)
    y = y_ref[...].astype(jnp.float32)
    # Numerically stable BCE-with-logits: max(x,0) - x*y + log1p(exp(-|x|))
    bce = jnp.maximum(x, 0.0) - x * y + jnp.log1p(jnp.exp(-jnp.abs(x)))
    # Reduce only across vreg groups (leading axis): pure vreg adds, no
    # sublane/XLU reduce; aligned (8,128) store.  Scale by the tile weight
    # once on the small (8,128) result.
    out_ref[...] = w_ref[i] * jnp.sum(bce, axis=0, keepdims=True)


def _bce_partial_sum(tile_w, x_slab, y_slab, tg):
    """Run the fused BCE partial-sum kernel over a packed (G, 8, 128) slab."""
    groups = x_slab.shape[0]
    grid = groups // tg

    in_bytes = tg * _GROUP * (x_slab.dtype.itemsize + y_slab.dtype.itemsize)
    vmem_limit = int(min(max(2 * in_bytes + (1 << 20), 16 << 20), 40 << 20))

    n_elems = groups * _GROUP
    cost = pl.CostEstimate(
        flops=12 * n_elems,
        transcendentals=2 * n_elems,
        bytes_accessed=n_elems * (x_slab.dtype.itemsize + y_slab.dtype.itemsize)
        + grid * _GROUP * 4,
    )

    partials = pl.pallas_call(
        _bce_partial_kernel,
        out_shape=jax.ShapeDtypeStruct((grid, _SUBLANES, _LANES), jnp.float32),
        grid_spec=pltpu.PrefetchScalarGridSpec(
            num_scalar_prefetch=1,
            grid=(grid,),
            in_specs=[
                pl.BlockSpec((tg, _SUBLANES, _LANES), lambda i, w: (i, 0, 0)),
                pl.BlockSpec((tg, _SUBLANES, _LANES), lambda i, w: (i, 0, 0)),
            ],
            out_specs=pl.BlockSpec((1, _SUBLANES, _LANES), lambda i, w: (i, 0, 0)),
        ),
        compiler_params=pltpu.CompilerParams(
            dimension_semantics=("parallel",),
            vmem_limit_bytes=vmem_limit,
        ),
        cost_estimate=cost,
    )(tile_w, x_slab, y_slab)

    # Tiny trailing reduction (grid x 8 x 128 f32) in plain JAX.
    return jnp.sum(partials)


def _interpolate_nearest(target, out_h, out_w):
    """Matches torch F.interpolate(target, [out_h, out_w]) (default 'nearest')."""
    _, _, in_h, in_w = target.shape
    if (in_h, in_w) == (out_h, out_w):
        return target  # identity on the finest scale: no gather, free view
    if in_h % out_h == 0 and in_w % out_w == 0:
        # integer downsample: floor(i*in/out) == i*(in//out) -> strided slice
        return target[:, :, :: in_h // out_h, :: in_w // out_w]
    idx_h = (jnp.arange(out_h) * in_h) // out_h
    idx_w = (jnp.arange(out_w) * in_w) // out_w
    return target[:, :, idx_h, :][:, :, :, idx_w]


def _pad_to(flat, n_total, pad_value):
    pad = n_total - flat.shape[0]
    if pad == 0:
        return flat
    return jnp.pad(flat, (0, pad), constant_values=pad_value)


def _pad_value_x(dtype):
    # Large-negative but finite: max(x,0)=0, x*y=0 (y pad is 0), exp(-|x|)=0.
    return float(jnp.finfo(dtype).min)


def multi_scale_bce_loss(predictions, target, *, tile_rows=4096):
    """sum_s w_s * mean(BCEWithLogits(pred_s, nearest_resize(target)))."""
    assert len(predictions) == len(_WEIGHTS)
    n_scales = len(predictions)
    sizes = [int(p.size) for p in predictions]
    tile_groups = max(1, _round_up(tile_rows, _SUBLANES) // _SUBLANES)

    def _prep(idx):
        pred = predictions[idx]
        tgt = _interpolate_nearest(target, pred.shape[2], pred.shape[3])
        return pred.reshape(-1), tgt.reshape(-1), sizes[idx]

    # ---- Dominant scale: streamed directly (no pad+concat round-trip). ----
    big_idx = max(range(n_scales), key=lambda i: sizes[i])
    x_big, y_big, n_big = _prep(big_idx)
    groups_big = _cdiv(n_big, _GROUP)
    # Aim for >= 2 tiles so a 2-TC chip (v7x) gets balanced work.
    tg_big = min(tile_groups, max(1, _cdiv(groups_big, 2)))
    groups_big_p = _round_up(groups_big, tg_big)
    x_big = _pad_to(x_big, groups_big_p * _GROUP, _pad_value_x(x_big.dtype))
    y_big = _pad_to(y_big, groups_big_p * _GROUP, 0.0)
    x_big = x_big.reshape(groups_big_p, _SUBLANES, _LANES)
    y_big = y_big.reshape(groups_big_p, _SUBLANES, _LANES)
    grid_big = groups_big_p // tg_big
    w_big = jnp.full((grid_big,), _WEIGHTS[big_idx] / n_big, jnp.float32)
    loss = _bce_partial_sum(w_big, x_big, y_big, tg_big)

    # ---- Remaining scales: one packed, tile-aligned slab + SMEM weights. ----
    rest = [i for i in range(n_scales) if i != big_idx]
    max_rest_groups = max(_cdiv(sizes[i], _GROUP) for i in rest)
    tg_c = min(tile_groups, max(1, max_rest_groups))
    tile_elems = tg_c * _GROUP

    xs, ys, ws = [], [], []
    for i in rest:
        x_f, y_f, n_i = _prep(i)
        n_pad = _round_up(n_i, tile_elems)          # each scale owns whole tiles
        xs.append(_pad_to(x_f, n_pad, _pad_value_x(x_f.dtype)))
        ys.append(_pad_to(y_f, n_pad, 0.0))
        ws.append(jnp.full((n_pad // tile_elems,), _WEIGHTS[i] / n_i, jnp.float32))
    x_slab = jnp.concatenate(xs).reshape(-1, _SUBLANES, _LANES)
    y_slab = jnp.concatenate(ys).reshape(-1, _SUBLANES, _LANES)
    w_tiles = jnp.concatenate(ws)
    loss = loss + _bce_partial_sum(w_tiles, x_slab, y_slab, tg_c)
    return loss


def _reference_loss(predictions, target):
    """Pure-JAX reference for validation."""
    loss = jnp.float32(0.0)
    for w, pred in zip(_WEIGHTS, predictions):
        x = pred.astype(jnp.float32)
        y = _interpolate_nearest(target, pred.shape[2], pred.shape[3]).astype(jnp.float32)
        l = jnp.maximum(x, 0.0) - x * y + jnp.log1p(jnp.exp(-jnp.abs(x)))
        loss = loss + jnp.float32(w) * jnp.mean(l)
    return loss


if __name__ == "__main__":
    key = jax.random.PRNGKey(0)
    k_t, k0, k1, k2, k3 = jax.random.split(key, 5)

    N, C, H, W = 2, 4, 16, 16
    target = (jax.random.uniform(k_t, (N, C, H, W)) > 0.5).astype(jnp.float32)

    # Multi-scale logits (NCHW), coarsest -> finest, matching weight count.
    predictions = [
        jax.random.normal(k0, (N, C, 2, 2), jnp.float32),
        jax.random.normal(k1, (N, C, 4, 4), jnp.float32),
        jax.random.normal(k2, (N, C, 8, 8), jnp.float32),
        jax.random.normal(k3, (N, C, 16, 16), jnp.float32),
    ]

    loss_fn = jax.jit(multi_scale_bce_loss)
    out = jax.block_until_ready(loss_fn(predictions, target))

    ref = _reference_loss(predictions, target)
    assert jnp.allclose(out, ref, rtol=1e-4, atol=1e-6), (out, ref)

    print("KERNEL_OK")
</pallas_src>

<mosaic_0001>
module attributes {stable_mosaic.version = 11 : i64} {
  func.func @_bce_partial_kernel(%arg0: i32, %arg1: memref<3xf32, #tpu.memory_space<smem>>, %arg2: memref<1x8x128xf32, #tpu.memory_space<vmem>>, %arg3: memref<1x8x128xf32, #tpu.memory_space<vmem>>, %arg4: memref<1x8x128xf32, #tpu.memory_space<vmem>>) attributes {dimension_semantics = [#tpu.dimension_semantics<parallel>], iteration_bounds = array<i64: 3>, scalar_prefetch = 1 : i64, scratch_operands = 0 : i64, tpu.core_type = #tpu.core_type<tc>, window_params = [{transform_indices = @transform_0, window_bounds = array<i64: 1, 8, 128>}, {transform_indices = @transform_1, window_bounds = array<i64: 1, 8, 128>}, {transform_indices = @transform_2, window_bounds = array<i64: 1, 8, 128>}]} {
    %c0 = arith.constant 0 : index
    %c0_0 = arith.constant 0 : index
    %c0_1 = arith.constant 0 : index
    %0 = vector.load %arg2[%c0, %c0_0, %c0_1] : memref<1x8x128xf32, #tpu.memory_space<vmem>>, vector<1x8x128xf32>
    %c0_2 = arith.constant 0 : index
    %c0_3 = arith.constant 0 : index
    %c0_4 = arith.constant 0 : index
    %1 = vector.load %arg3[%c0_2, %c0_3, %c0_4] : memref<1x8x128xf32, #tpu.memory_space<vmem>>, vector<1x8x128xf32>
    %cst = arith.constant 0.000000e+00 : f32
    %2 = vector.broadcast %cst : f32 to vector<1x8x128xf32>
    %3 = arith.maximumf %0, %2 : vector<1x8x128xf32>
    %4 = arith.mulf %0, %1 : vector<1x8x128xf32>
    %5 = arith.subf %3, %4 : vector<1x8x128xf32>
    %6 = math.absf %0 : vector<1x8x128xf32>
    %cst_5 = arith.constant 0.000000e+00 : f32
    %7 = vector.broadcast %cst_5 : f32 to vector<1x8x128xf32>
    %8 = arith.subf %7, %6 : vector<1x8x128xf32>
    %9 = math.exp %8 : vector<1x8x128xf32>
    %10 = math.log1p %9 : vector<1x8x128xf32>
    %11 = arith.addf %5, %10 : vector<1x8x128xf32>
    %12 = arith.index_cast %arg0 : i32 to index
    %13 = memref.load %arg1[%12] : memref<3xf32, #tpu.memory_space<smem>>
    %cst_6 = arith.constant dense<0.000000e+00> : vector<8x128xf32>
    %14 = vector.multi_reduction <add>, %11, %cst_6 [0] : vector<1x8x128xf32> to vector<8x128xf32>
    %15 = vector.shape_cast %14 : vector<8x128xf32> to vector<1x8x128xf32>
    %16 = vector.broadcast %13 : f32 to vector<1x8x128xf32>
    %17 = arith.mulf %16, %15 : vector<1x8x128xf32>
    %c0_7 = arith.constant 0 : index
    %c0_8 = arith.constant 0 : index
    %c0_9 = arith.constant 0 : index
    %18 = vector.load %arg4[%c0_7, %c0_8, %c0_9] : memref<1x8x128xf32, #tpu.memory_space<vmem>>, vector<1x8x128xf32>
    tpu.vector_store %arg4[%c0_7, %c0_8, %c0_9], %17 {strides = array<i32>} : memref<1x8x128xf32, #tpu.memory_space<vmem>>, vector<1x8x128xf32>,
    return
  }
  func.func @transform_0(%arg0: i32, %arg1: memref<3xf32, #tpu.memory_space<smem>>) -> (i32, i32, i32) {
    %c0_i32 = arith.constant 0 : i32
    %c0_i32_0 = arith.constant 0 : i32
    %c0_i32_1 = arith.constant 0 : i32
    return %arg0, %c0_i32, %c0_i32_0 : i32, i32, i32
  }
  func.func @transform_1(%arg0: i32, %arg1: memref<3xf32, #tpu.memory_space<smem>>) -> (i32, i32, i32) {
    %c0_i32 = arith.constant 0 : i32
    %c0_i32_0 = arith.constant 0 : i32
    %c0_i32_1 = arith.constant 0 : i32
    return %arg0, %c0_i32, %c0_i32_0 : i32, i32, i32
  }
  func.func @transform_2(%arg0: i32, %arg1: memref<3xf32, #tpu.memory_space<smem>>) -> (i32, i32, i32) {
    %c0_i32 = arith.constant 0 : i32
    %c0_i32_0 = arith.constant 0 : i32
    %c0_i32_1 = arith.constant 0 : i32
    return %arg0, %c0_i32, %c0_i32_0 : i32, i32, i32
  }
}

module attributes {stable_mosaic.version = 11 : i64} {
  func.func @_bce_partial_kernel(%arg0: i32, %arg1: memref<2xf32, #tpu.memory_space<smem>>, %arg2: memref<1x8x128xf32, #tpu.memory_space<vmem>>, %arg3: memref<1x8x128xf32, #tpu.memory_space<vmem>>, %arg4: memref<1x8x128xf32, #tpu.memory_space<vmem>>) attributes {dimension_semantics = [#tpu.dimension_semantics<parallel>], iteration_bounds = array<i64: 2>, scalar_prefetch = 1 : i64, scratch_operands = 0 : i64, tpu.core_type = #tpu.core_type<tc>, window_params = [{transform_indices = @transform_0, window_bounds = array<i64: 1, 8, 128>}, {transform_indices = @transform_1, window_bounds = array<i64: 1, 8, 128>}, {transform_indices = @transform_2, window_bounds = array<i64: 1, 8, 128>}]} {
    %c0 = arith.constant 0 : index
    %c0_0 = arith.constant 0 : index
    %c0_1 = arith.constant 0 : index
    %0 = vector.load %arg2[%c0, %c0_0, %c0_1] : memref<1x8x128xf32, #tpu.memory_space<vmem>>, vector<1x8x128xf32>
    %c0_2 = arith.constant 0 : index
    %c0_3 = arith.constant 0 : index
    %c0_4 = arith.constant 0 : index
    %1 = vector.load %arg3[%c0_2, %c0_3, %c0_4] : memref<1x8x128xf32, #tpu.memory_space<vmem>>, vector<1x8x128xf32>
    %cst = arith.constant 0.000000e+00 : f32
    %2 = vector.broadcast %cst : f32 to vector<1x8x128xf32>
    %3 = arith.maximumf %0, %2 : vector<1x8x128xf32>
    %4 = arith.mulf %0, %1 : vector<1x8x128xf32>
    %5 = arith.subf %3, %4 : vector<1x8x128xf32>
    %6 = math.absf %0 : vector<1x8x128xf32>
    %cst_5 = arith.constant 0.000000e+00 : f32
    %7 = vector.broadcast %cst_5 : f32 to vector<1x8x128xf32>
    %8 = arith.subf %7, %6 : vector<1x8x128xf32>
    %9 = math.exp %8 : vector<1x8x128xf32>
    %10 = math.log1p %9 : vector<1x8x128xf32>
    %11 = arith.addf %5, %10 : vector<1x8x128xf32>
    %12 = arith.index_cast %arg0 : i32 to index
    %13 = memref.load %arg1[%12] : memref<2xf32, #tpu.memory_space<smem>>
    %cst_6 = arith.constant dense<0.000000e+00> : vector<8x128xf32>
    %14 = vector.multi_reduction <add>, %11, %cst_6 [0] : vector<1x8x128xf32> to vector<8x128xf32>
    %15 = vector.shape_cast %14 : vector<8x128xf32> to vector<1x8x128xf32>
    %16 = vector.broadcast %13 : f32 to vector<1x8x128xf32>
    %17 = arith.mulf %16, %15 : vector<1x8x128xf32>
    %c0_7 = arith.constant 0 : index
    %c0_8 = arith.constant 0 : index
    %c0_9 = arith.constant 0 : index
    %18 = vector.load %arg4[%c0_7, %c0_8, %c0_9] : memref<1x8x128xf32, #tpu.memory_space<vmem>>, vector<1x8x128xf32>
    tpu.vector_store %arg4[%c0_7, %c0_8, %c0_9], %17 {strides = array<i32>} : memref<1x8x128xf32, #tpu.memory_space<vmem>>, vector<1x8x128xf32>,
    return
  }
  func.func @transform_0(%arg0: i32, %arg1: memref<2xf32, #tpu.memory_space<smem>>) -> (i32, i32, i32) {
    %c0_i32 = arith.constant 0 : i32
    %c0_i32_0 = arith.constant 0 : i32
    %c0_i32_1 = arith.constant 0 : i32
    return %arg0, %c0_i32, %c0_i32_0 : i32, i32, i32
  }
  func.func @transform_1(%arg0: i32, %arg1: memref<2xf32, #tpu.memory_space<smem>>) -> (i32, i32, i32) {
    %c0_i32 = arith.constant 0 : i32
    %c0_i32_0 = arith.constant 0 : i32
    %c0_i32_1 = arith.constant 0 : i32
    return %arg0, %c0_i32, %c0_i32_0 : i32, i32, i32
  }
  func.func @transform_2(%arg0: i32, %arg1: memref<2xf32, #tpu.memory_space<smem>>) -> (i32, i32, i32) {
    %c0_i32 = arith.constant 0 : i32
    %c0_i32_0 = arith.constant 0 : i32
    %c0_i32_1 = arith.constant 0 : i32
    return %arg0, %c0_i32, %c0_i32_0 : i32, i32, i32
  }
}

</mosaic_0001>

<bundles_post_ra>
// kernel: multi_scale_bce_loss.2
= control target key start
LH: loop header
LB: loop body
LE: loop exit
PB: predicated region body
PF: predicated region fallthrough
CT: control target
= control target key end

     0   :  { %s341_s0 = inlined_call_operand.vmem [shape: f32[2], index: 0, kind: input, shape index: {}]   ;;  %s342_s1 = inlined_call_operand.vmem [shape: f32[2,8,128], index: 1, kind: input, shape index: {}]   ;;  %s343_s2 = inlined_call_operand.vmem [shape: f32[2,8,128], index: 2, kind: input, shape index: {}]   ;;  %s344_s3 = inlined_call_operand.vmem [shape: f32[2,8,128], index: 3, kind: output, shape index: {}]  }
   0x1   :  { %s8_s14 = sshll.u32 %s341_s0, 4  ;;  %s9_s14 = int_to_ptr.vmem [resolvable:$true] %s8_s14 }
   0x2   :  { %s275_s15 = scalar_lea.vmem %s9_s14, 16  ;;  %p280_p1 = scmp.lt.s32.totalorder %s9_s14, %s9_s14 }
   0x3   :  { %p276_p0 = scmp.ne.s32.totalorder %s9_s14, %s275_s15  ;;  %p281_p2 = scmp.lt.s32.totalorder %s275_s15, %s275_s15 }
   0x5   :  { %p282_p3 = por %p281_p2, %p280_p1 }
   0x7   :  { %p283_p4 = pnand %p282_p3, %p276_p0 }
   0x9   :  { %286 = shalt.err (!%p283_p4)  }
   0xa   :  { %s297_s16 = smov [#allocation3]  }
   0xb   :  { %11 = dma.vmem_to_smem %s9_s14, 16, %s297_s16, [#allocation2] }
   0xc   :  { %291 = dma.done.wait [#allocation2], 16 }
   0xd   :  { %292 = vsyncadd [#allocation2], 4294967280 }
   0xe   :  { %13 = sfence }
   0xf   :  { %s321_s17 = smov 0  }
  0x10 LB: > { %s252_s0 = sadd.s32 4294967295, %s295_s17   ;;  %p256_p5 = scmp.ge.s32.totalorder %s295_s17, 1  ;;  %s295_s17 = sphi %s321_s17, %s19_s17  }
  0x11   : > { %p127_p6 = scmp.lt.s32.totalorder %s295_s17, 3 }
  0x13   : > { %p128_p7 = pnand %p256_p5, %p127_p6 }
  0x14   : > { %p151_p8 = scmp.lt.s32.totalorder (!%p128_p7), %s252_s0, 1  ;;  %s182_s26 = sld [smem:[#allocation3 + %s252_s0]] (!%p128_p7) }
  0x15   : > { %131 = sbr.rel (%p128_p7) target bundleno = 71 (0x47), region = 28 }
  0x1a   : > { %v184_v17 = vstv (!%p128_p7), %s182_s26 }
  0x1c   : > { %s152_s18 = scalar_select %p151_p8, %s252_s0, 1 }
  0x1e   : > { %s257_s19 = sshll.u32 %s152_s18, 3 }
  0x1f   : > { %s154_s22 = scalar_lea.vmem %s342_s1, %s257_s19  ;;  %s158_s25 = scalar_lea.vmem %s343_s2, %s257_s19 }
  0x20   : > { %v163_v0 = vld [vmem:[%s154_s22] sm:$0xff]  ;;  %s162_s29 = scalar_lea.vmem %s344_s3, %s257_s19 }
  0x21   : > { %v168_v1 = vand.u32 2147483647, %v163_v0  ;;  %v164_v7 = vld [vmem:[%s158_s25] sm:$0xff]  ;;  %v165_v9 = vmax.f32 %v163_v0, 0.0 }
  0x22   : > { %v166_v10 = vmul.f32 %v164_v7, %v163_v0 }
  0x23   : > { %v169_v2 = vsub.f32 0.0, %v168_v1 }
  0x24   : > { %v167_v14 = vsub.f32 %v165_v9, %v166_v10 }
  0x25   : > { %v170_v3 = vmul.f32 1.442695, %v169_v2 }
  0x27   : > { %271 = vpow2.f32 %v170_v3 }
  0x31   : > { %v272_v4 = vpop.eup %271 }
  0x32   : > { %v172_v5 = vadd.f32 1.0, %v272_v4  ;;  %v175_v6 = vmul.f32 -0.5, %v272_v4  ;;  %v178_v11 = vand.u32 2147483647, %v272_v4 }
  0x34   : > { %273 = vlog2.f32 %v172_v5  ;;  %v176_v8 = vadd.f32 1.0, %v175_v6  ;;  %vm179_vm0 = vcmp.lt.f32.partialorder %v178_v11, 0.0004427343 }
  0x36   : > { %v177_v12 = vmul.f32 %v272_v4, %v176_v8 }
  0x3e   : > { %v274_v13 = vpop.eup %273 }
  0x3f   : > { %v174_v15 = vmul.f32 0.6931472, %v274_v13 }
  0x41   : > { %v180_v16 = vsel %vm179_vm0, %v177_v12, %v174_v15 }
  0x42   : > { %v181_v18 = vadd.f32 %v180_v16, %v167_v14 }
  0x44   : > { %v185_v19 = vmul.f32 %v184_v17, %v181_v18 }
  0x46   : > { %186 = vst [vmem:[%s162_s29] sm:$0xff] %v185_v19 }
  0x47 PF: > { %s19_s17 = sadd.s32 1, %s295_s17  }
  0x48   : > { %p16_p9 = scmp.ge.s32.totalorder %s19_s17, 4  }
  0x4a   :  { %18 = sbr.rel (!%p16_p9) target bundleno = 16 (0x10), region = 61 }

// kernel: multi_scale_bce_loss.3
= control target key start
LH: loop header
LB: loop body
LE: loop exit
PB: predicated region body
PF: predicated region fallthrough
CT: control target
= control target key end

     0   :  { %s341_s0 = inlined_call_operand.vmem [shape: f32[3], index: 0, kind: input, shape index: {}]   ;;  %s342_s1 = inlined_call_operand.vmem [shape: f32[3,8,128], index: 1, kind: input, shape index: {}]   ;;  %s343_s2 = inlined_call_operand.vmem [shape: f32[3,8,128], index: 2, kind: input, shape index: {}]   ;;  %s344_s3 = inlined_call_operand.vmem [shape: f32[3,8,128], index: 3, kind: output, shape index: {}]  }
   0x1   :  { %s8_s14 = sshll.u32 %s341_s0, 4  ;;  %s9_s14 = int_to_ptr.vmem [resolvable:$true] %s8_s14 }
   0x2   :  { %s275_s15 = scalar_lea.vmem %s9_s14, 16  ;;  %p280_p1 = scmp.lt.s32.totalorder %s9_s14, %s9_s14 }
   0x3   :  { %p276_p0 = scmp.ne.s32.totalorder %s9_s14, %s275_s15  ;;  %p281_p2 = scmp.lt.s32.totalorder %s275_s15, %s275_s15 }
   0x5   :  { %p282_p3 = por %p281_p2, %p280_p1 }
   0x7   :  { %p283_p4 = pnand %p282_p3, %p276_p0 }
   0x9   :  { %286 = shalt.err (!%p283_p4)  }
   0xa   :  { %s297_s16 = smov [#allocation3]  }
   0xb   :  { %11 = dma.vmem_to_smem %s9_s14, 16, %s297_s16, [#allocation2] }
   0xc   :  { %291 = dma.done.wait [#allocation2], 16 }
   0xd   :  { %292 = vsyncadd [#allocation2], 4294967280 }
   0xe   :  { %13 = sfence }
   0xf   :  { %s321_s17 = smov 0  }
  0x10 LB: > { %s252_s0 = sadd.s32 4294967295, %s295_s17   ;;  %p256_p5 = scmp.ge.s32.totalorder %s295_s17, 1  ;;  %s295_s17 = sphi %s321_s17, %s19_s17  }
  0x11   : > { %p127_p6 = scmp.lt.s32.totalorder %s295_s17, 4 }
  0x13   : > { %p128_p7 = pnand %p256_p5, %p127_p6 }
  0x14   : > { %p151_p8 = scmp.lt.s32.totalorder (!%p128_p7), %s252_s0, 2  ;;  %s182_s26 = sld [smem:[#allocation3 + %s252_s0]] (!%p128_p7) }
  0x15   : > { %131 = sbr.rel (%p128_p7) target bundleno = 71 (0x47), region = 28 }
  0x1a   : > { %v184_v17 = vstv (!%p128_p7), %s182_s26 }
  0x1c   : > { %s152_s18 = scalar_select %p151_p8, %s252_s0, 2 }
  0x1e   : > { %s257_s19 = sshll.u32 %s152_s18, 3 }
  0x1f   : > { %s154_s22 = scalar_lea.vmem %s342_s1, %s257_s19  ;;  %s158_s25 = scalar_lea.vmem %s343_s2, %s257_s19 }
  0x20   : > { %v163_v0 = vld [vmem:[%s154_s22] sm:$0xff]  ;;  %s162_s29 = scalar_lea.vmem %s344_s3, %s257_s19 }
  0x21   : > { %v168_v1 = vand.u32 2147483647, %v163_v0  ;;  %v164_v7 = vld [vmem:[%s158_s25] sm:$0xff]  ;;  %v165_v9 = vmax.f32 %v163_v0, 0.0 }
  0x22   : > { %v166_v10 = vmul.f32 %v164_v7, %v163_v0 }
  0x23   : > { %v169_v2 = vsub.f32 0.0, %v168_v1 }
  0x24   : > { %v167_v14 = vsub.f32 %v165_v9, %v166_v10 }
  0x25   : > { %v170_v3 = vmul.f32 1.442695, %v169_v2 }
  0x27   : > { %271 = vpow2.f32 %v170_v3 }
  0x31   : > { %v272_v4 = vpop.eup %271 }
  0x32   : > { %v172_v5 = vadd.f32 1.0, %v272_v4  ;;  %v175_v6 = vmul.f32 -0.5, %v272_v4  ;;  %v178_v11 = vand.u32 2147483647, %v272_v4 }
  0x34   : > { %273 = vlog2.f32 %v172_v5  ;;  %v176_v8 = vadd.f32 1.0, %v175_v6  ;;  %vm179_vm0 = vcmp.lt.f32.partialorder %v178_v11, 0.0004427343 }
  0x36   : > { %v177_v12 = vmul.f32 %v272_v4, %v176_v8 }
  0x3e   : > { %v274_v13 = vpop.eup %273 }
  0x3f   : > { %v174_v15 = vmul.f32 0.6931472, %v274_v13 }
  0x41   : > { %v180_v16 = vsel %vm179_vm0, %v177_v12, %v174_v15 }
  0x42   : > { %v181_v18 = vadd.f32 %v180_v16, %v167_v14 }
  0x44   : > { %v185_v19 = vmul.f32 %v184_v17, %v181_v18 }
  0x46   : > { %186 = vst [vmem:[%s162_s29] sm:$0xff] %v185_v19 }
  0x47 PF: > { %s19_s17 = sadd.s32 1, %s295_s17  }
  0x48   : > { %p16_p9 = scmp.ge.s32.totalorder %s19_s17, 5  }
  0x4a   :  { %18 = sbr.rel (!%p16_p9) target bundleno = 16 (0x10), region = 61 }

</bundles_post_ra>
